<compile_context>
chip_gen: v6e
topology: v6e:2x2x1
jax: 0.10.0
libtpu: 0.0.40
codegen_flags: <defaults>
</compile_context>

<pallas_src>
import functools

import jax
import jax.numpy as jnp
from jax.experimental import pallas as pl
from jax.experimental.pallas import tpu as pltpu


_MASK = -1e30  # finite "−inf" so padded rows never produce NaNs


def _round_up(x: int, m: int) -> int:
    return (x + m - 1) // m * m


def _choose_tile_n(n: int, l: int, itemsize: int) -> int:
    """Pick the N tile: big enough to hide per-step overhead, small enough that the
    double-buffered feats stream stays well inside v7x's 64 MiB VMEM."""
    budget = 16 * 1024 * 1024                      # bytes for 2 x (TILE_N, L) feats buffers
    rows = budget // (2 * l * itemsize)
    rows = max(128, min(1024, (rows // 128) * 128))  # lane/MXU friendly multiple of 128
    if n <= rows:
        return _round_up(max(n, 1), 8)             # single full-extent tile (sublane aligned)
    return rows


def _attention_pool_kernel(feat_ref, w1_ref, b1_ref, w2_ref, b2_ref,
                           scores_ref, m_ref, l_ref, pooled_ref, *, n_valid):
    """One N-tile of the online-softmax attention pooling.

    feat_ref : (TILE_N, L) bf16     w1_ref: (L, D) bf16   b1_ref: (1, D) f32
    w2_ref   : (D, K) f32           b2_ref: (1, K) f32
    scores_ref: (TILE_N, K) f32  per-tile raw scores (padded rows masked)
    m_ref, l_ref: (1, K) f32     resident running max / sum accumulators
    pooled_ref : (L, K) f32      resident pooled^T accumulator
    """
    i = pl.program_id(0)
    tile_n = feat_ref.shape[0]

    @pl.when(i == 0)
    def _init():
        m_ref[...] = jnp.full_like(m_ref, _MASK)
        l_ref[...] = jnp.zeros_like(l_ref)
        pooled_ref[...] = jnp.zeros_like(pooled_ref)

    feats = feat_ref[...]                                             # (T, L) bf16

    # Linear(L -> D) + tanh : bf16 MXU matmul, f32 accumulation.
    h = jnp.tanh(jnp.dot(feats, w1_ref[...],
                         preferred_element_type=jnp.float32) + b1_ref[...])  # (T, D) f32

    # Linear(D -> K) : tiny, keep f32 end-to-end.
    a = jnp.dot(h, w2_ref[...], preferred_element_type=jnp.float32) + b2_ref[...]  # (T, K)

    # Mask rows that are only padding (N was padded up to a tile multiple).
    row = i * tile_n + jax.lax.broadcasted_iota(jnp.int32, a.shape, 0)
    a = jnp.where(row < n_valid, a, _MASK)
    scores_ref[...] = a

    # Online softmax over N (axis 0); stats are (1, K).
    m_old = m_ref[...]
    m_new = jnp.maximum(m_old, jnp.max(a, axis=0, keepdims=True))
    corr = jnp.exp(m_old - m_new)
    p = jnp.exp(a - m_new)                                            # (T, K), in [0, 1]
    l_ref[...] = corr * l_ref[...] + jnp.sum(p, axis=0, keepdims=True)
    m_ref[...] = m_new

    # pooled^T accumulator: (L, K) += feats^T @ p -- the MXU does the "transpose"
    # by contracting the N axis of both operands.
    upd = jax.lax.dot_general(feats, p.astype(feats.dtype),
                              dimension_numbers=(((0,), (0,)), ((), ())),
                              preferred_element_type=jnp.float32)     # (L, K) f32
    pooled_ref[...] = corr * pooled_ref[...] + upd

    @pl.when(i == pl.num_programs(0) - 1)
    def _finalize():
        pooled_ref[...] = pooled_ref[...] * pl.reciprocal(l_ref[...], approx=True)


def _softmax_finalize_kernel(scores_ref, m_ref, l_ref, aw_ref):
    """Cheap second pass: normalize raw scores with the global max / sum."""
    inv_l = pl.reciprocal(l_ref[...], approx=True)                    # (1, K)
    aw_ref[...] = jnp.exp(scores_ref[...] - m_ref[...]) * inv_l       # (T, K)


def attention_layer_forward(features, w1, b1, w2, b2, *, compute_dtype=jnp.bfloat16):
    """features: (..., L). Returns (attention_weights (K, N), pooled_features (K, L))."""
    input_dims, hidden_dims = w1.shape
    attention_dims = w2.shape[1]

    feats = features.reshape(-1, input_dims).astype(jnp.float32)
    n = feats.shape[0]

    tile_n = _choose_tile_n(n, input_dims, jnp.dtype(compute_dtype).itemsize)
    n_pad = _round_up(n, tile_n)
    if n_pad != n:
        feats = jnp.pad(feats, ((0, n_pad - n), (0, 0)))
    num_tiles = n_pad // tile_n

    feats_c = feats.astype(compute_dtype)
    w1_c = w1.astype(compute_dtype)
    b1_r = b1.reshape(1, hidden_dims).astype(jnp.float32)
    w2_f = w2.astype(jnp.float32)
    b2_r = b2.reshape(1, attention_dims).astype(jnp.float32)

    def const2d(shape):
        return pl.BlockSpec(shape, lambda i: (0, 0))   # resident: fetched/written once

    scores, m_fin, l_fin, pooled_t = pl.pallas_call(
        functools.partial(_attention_pool_kernel, n_valid=n),
        grid=(num_tiles,),
        in_specs=[
            pl.BlockSpec((tile_n, input_dims), lambda i: (i, 0)),     # streamed feats
            const2d((input_dims, hidden_dims)),                       # W1 (resident)
            const2d((1, hidden_dims)),                                # b1
            const2d((hidden_dims, attention_dims)),                   # W2
            const2d((1, attention_dims)),                             # b2
        ],
        out_specs=(
            pl.BlockSpec((tile_n, attention_dims), lambda i: (i, 0)), # raw scores per tile
            const2d((1, attention_dims)),                             # running max
            const2d((1, attention_dims)),                             # running sum
            const2d((input_dims, attention_dims)),                    # pooled^T accumulator
        ),
        out_shape=(
            jax.ShapeDtypeStruct((n_pad, attention_dims), jnp.float32),
            jax.ShapeDtypeStruct((1, attention_dims), jnp.float32),
            jax.ShapeDtypeStruct((1, attention_dims), jnp.float32),
            jax.ShapeDtypeStruct((input_dims, attention_dims), jnp.float32),
        ),
        compiler_params=pltpu.CompilerParams(
            dimension_semantics=("arbitrary",),          # N is a reduction axis
            vmem_limit_bytes=48 * 1024 * 1024),
    )(feats_c, w1_c, b1_r, w2_f, b2_r)

    aw_nk = pl.pallas_call(
        _softmax_finalize_kernel,
        grid=(num_tiles,),
        in_specs=[
            pl.BlockSpec((tile_n, attention_dims), lambda i: (i, 0)),
            const2d((1, attention_dims)),
            const2d((1, attention_dims)),
        ],
        out_specs=pl.BlockSpec((tile_n, attention_dims), lambda i: (i, 0)),
        out_shape=jax.ShapeDtypeStruct((n_pad, attention_dims), jnp.float32),
        compiler_params=pltpu.CompilerParams(
            dimension_semantics=("parallel",)),          # independent tiles (megacore-friendly)
    )(scores, m_fin, l_fin)

    attention_weights = aw_nk[:n].T          # (K, N) — tiny layout fixup outside the hot loop
    pooled_features = pooled_t.T             # (K, L)
    return attention_weights, pooled_features


def _reference_forward(features, w1, b1, w2, b2, compute_dtype=jnp.bfloat16):
    """Pure-JAX reference matching the kernel's bf16 input quantization."""
    input_dims = w1.shape[0]
    feats = features.reshape(-1, input_dims).astype(compute_dtype).astype(jnp.float32)
    w1_q = w1.astype(compute_dtype).astype(jnp.float32)
    h = jnp.tanh(feats @ w1_q + b1)
    a = h @ w2.astype(jnp.float32) + b2.astype(jnp.float32)   # (N, K)
    aw = jax.nn.softmax(a.T, axis=1)                          # (K, N)
    pooled = aw @ feats                                       # (K, L)
    return aw, pooled


if __name__ == "__main__":
    # Small shapes: batch=2, bag=4 instances, L=32, hidden D=16, attention K=2.
    batch, bag = 2, 4
    input_dims, hidden_dims, attention_dims = 32, 16, 2

    key = jax.random.PRNGKey(0)
    k_feat, k_w1, k_b1, k_w2, k_b2 = jax.random.split(key, 5)

    features = jax.random.normal(k_feat, (batch, bag, input_dims), jnp.float32)

    # Deterministic parameter init (PyTorch-Linear-like bounds), stored as (in, out).
    bound1 = 1.0 / (input_dims ** 0.5)
    w1 = jax.random.uniform(k_w1, (input_dims, hidden_dims), jnp.float32, -bound1, bound1)
    b1 = jax.random.uniform(k_b1, (hidden_dims,), jnp.float32, -bound1, bound1)
    bound2 = 1.0 / (hidden_dims ** 0.5)
    w2 = jax.random.uniform(k_w2, (hidden_dims, attention_dims), jnp.float32, -bound2, bound2)
    b2 = jax.random.uniform(k_b2, (attention_dims,), jnp.float32, -bound2, bound2)

    aw, pooled = attention_layer_forward(features, w1, b1, w2, b2)
    jax.block_until_ready((aw, pooled))

    aw_ref, pooled_ref = _reference_forward(features, w1, b1, w2, b2)

    n_total = batch * bag
    assert aw.shape == (attention_dims, n_total)
    assert pooled.shape == (attention_dims, input_dims)
    assert jnp.allclose(aw, aw_ref, atol=2e-2, rtol=2e-2)
    assert jnp.allclose(pooled, pooled_ref, atol=2e-2, rtol=2e-2)

    print("KERNEL_OK")
</pallas_src>

<mosaic_0001>
module attributes {stable_mosaic.version = 11 : i64} {
  func.func @_attention_pool_kernel(%arg0: i32, %arg1: memref<8x32xbf16, #tpu.memory_space<vmem>>, %arg2: memref<32x16xbf16, #tpu.memory_space<vmem>>, %arg3: memref<1x16xf32, #tpu.memory_space<vmem>>, %arg4: memref<16x2xf32, #tpu.memory_space<vmem>>, %arg5: memref<1x2xf32, #tpu.memory_space<vmem>>, %arg6: memref<8x2xf32, #tpu.memory_space<vmem>>, %arg7: memref<1x2xf32, #tpu.memory_space<vmem>>, %arg8: memref<1x2xf32, #tpu.memory_space<vmem>>, %arg9: memref<32x2xf32, #tpu.memory_space<vmem>>) attributes {dimension_semantics = [#tpu.dimension_semantics<arbitrary>], iteration_bounds = array<i64: 1>, scalar_prefetch = 0 : i64, scratch_operands = 0 : i64, tpu.core_type = #tpu.core_type<tc>, window_params = [{transform_indices = @transform_0, window_bounds = array<i64: 8, 32>}, {pipeline_mode = #tpu.pipeline_mode<synchronous>, transform_indices = @transform_1, window_bounds = array<i64: 32, 16>}, {pipeline_mode = #tpu.pipeline_mode<synchronous>, transform_indices = @transform_2, window_bounds = array<i64: 1, 16>}, {pipeline_mode = #tpu.pipeline_mode<synchronous>, transform_indices = @transform_3, window_bounds = array<i64: 16, 2>}, {pipeline_mode = #tpu.pipeline_mode<synchronous>, transform_indices = @transform_4, window_bounds = array<i64: 1, 2>}, {transform_indices = @transform_5, window_bounds = array<i64: 8, 2>}, {pipeline_mode = #tpu.pipeline_mode<synchronous>, transform_indices = @transform_6, window_bounds = array<i64: 1, 2>}, {pipeline_mode = #tpu.pipeline_mode<synchronous>, transform_indices = @transform_7, window_bounds = array<i64: 1, 2>}, {pipeline_mode = #tpu.pipeline_mode<synchronous>, transform_indices = @transform_8, window_bounds = array<i64: 32, 2>}]} {
    %c0_i32 = arith.constant 0 : i32
    %0 = arith.cmpi eq, %arg0, %c0_i32 : i32
    %1 = arith.extui %0 : i1 to i32
    %c0_i32_0 = arith.constant 0 : i32
    %2 = arith.cmpi ne, %1, %c0_i32_0 : i32
    scf.if %2 {
      %cst_32 = arith.constant -1.000000e+30 : f32
      %50 = vector.broadcast %cst_32 : f32 to vector<1x2xf32>
      %c0_33 = arith.constant 0 : index
      %c0_34 = arith.constant 0 : index
      %51 = vector.load %arg7[%c0_33, %c0_34] : memref<1x2xf32, #tpu.memory_space<vmem>>, vector<1x2xf32>
      tpu.vector_store %arg7[%c0_33, %c0_34], %50 {strides = array<i32>} : memref<1x2xf32, #tpu.memory_space<vmem>>, vector<1x2xf32>,
      %cst_35 = arith.constant 0.000000e+00 : f32
      %52 = vector.broadcast %cst_35 : f32 to vector<1x2xf32>
      %c0_36 = arith.constant 0 : index
      %c0_37 = arith.constant 0 : index
      %53 = vector.load %arg8[%c0_36, %c0_37] : memref<1x2xf32, #tpu.memory_space<vmem>>, vector<1x2xf32>
      tpu.vector_store %arg8[%c0_36, %c0_37], %52 {strides = array<i32>} : memref<1x2xf32, #tpu.memory_space<vmem>>, vector<1x2xf32>,
      %cst_38 = arith.constant 0.000000e+00 : f32
      %54 = vector.broadcast %cst_38 : f32 to vector<32x2xf32>
      %c0_39 = arith.constant 0 : index
      %c0_40 = arith.constant 0 : index
      %55 = vector.load %arg9[%c0_39, %c0_40] : memref<32x2xf32, #tpu.memory_space<vmem>>, vector<32x2xf32>
      tpu.vector_store %arg9[%c0_39, %c0_40], %54 {strides = array<i32>} : memref<32x2xf32, #tpu.memory_space<vmem>>, vector<32x2xf32>,
    } else {
    }
    %c0 = arith.constant 0 : index
    %c0_1 = arith.constant 0 : index
    %3 = vector.load %arg1[%c0, %c0_1] : memref<8x32xbf16, #tpu.memory_space<vmem>>, vector<8x32xbf16>
    %c0_2 = arith.constant 0 : index
    %c0_3 = arith.constant 0 : index
    %4 = vector.load %arg2[%c0_2, %c0_3] : memref<32x16xbf16, #tpu.memory_space<vmem>>, vector<32x16xbf16>
    %cst = arith.constant dense<0.000000e+00> : vector<8x16xf32>
    %5 = tpu.matmul %3, %4, %cst {dimension_numbers = #tpu.dot_dimension_numbers<[1], [0], [0], [1], [0, 0, 1, 1], [], []>} : vector<8x32xbf16>, vector<32x16xbf16>, vector<8x16xf32> -> vector<8x16xf32>
    %c0_4 = arith.constant 0 : index
    %c0_5 = arith.constant 0 : index
    %6 = vector.load %arg3[%c0_4, %c0_5] : memref<1x16xf32, #tpu.memory_space<vmem>>, vector<1x16xf32>
    %7 = vector.broadcast %6 : vector<1x16xf32> to vector<8x16xf32>
    %8 = arith.addf %5, %7 : vector<8x16xf32>
    %9 = math.tanh %8 : vector<8x16xf32>
    %c0_6 = arith.constant 0 : index
    %c0_7 = arith.constant 0 : index
    %10 = vector.load %arg4[%c0_6, %c0_7] : memref<16x2xf32, #tpu.memory_space<vmem>>, vector<16x2xf32>
    %cst_8 = arith.constant dense<0.000000e+00> : vector<8x2xf32>
    %11 = tpu.matmul %9, %10, %cst_8 {dimension_numbers = #tpu.dot_dimension_numbers<[1], [0], [0], [1], [0, 0, 1, 1], [], []>} : vector<8x16xf32>, vector<16x2xf32>, vector<8x2xf32> -> vector<8x2xf32>
    %c0_9 = arith.constant 0 : index
    %c0_10 = arith.constant 0 : index
    %12 = vector.load %arg5[%c0_9, %c0_10] : memref<1x2xf32, #tpu.memory_space<vmem>>, vector<1x2xf32>
    %13 = vector.broadcast %12 : vector<1x2xf32> to vector<8x2xf32>
    %14 = arith.addf %11, %13 : vector<8x2xf32>
    %c8_i32 = arith.constant 8 : i32
    %15 = arith.muli %arg0, %c8_i32 : i32
    %16 = tpu.iota {dimensions = array<i32: 0>} : vector<8x2xi32>
    %17 = vector.broadcast %15 : i32 to vector<8x2xi32>
    %18 = arith.addi %17, %16 : vector<8x2xi32>
    %c8_i32_11 = arith.constant 8 : i32
    %19 = vector.broadcast %c8_i32_11 : i32 to vector<8x2xi32>
    %20 = arith.cmpi slt, %18, %19 : vector<8x2xi32>
    %cst_12 = arith.constant -1.000000e+30 : f32
    %21 = vector.broadcast %cst_12 : f32 to vector<8x2xf32>
    %22 = arith.select %20, %14, %21 : vector<8x2xi1>, vector<8x2xf32>
    %c0_13 = arith.constant 0 : index
    %c0_14 = arith.constant 0 : index
    %23 = vector.load %arg6[%c0_13, %c0_14] : memref<8x2xf32, #tpu.memory_space<vmem>>, vector<8x2xf32>
    tpu.vector_store %arg6[%c0_13, %c0_14], %22 {strides = array<i32>} : memref<8x2xf32, #tpu.memory_space<vmem>>, vector<8x2xf32>,
    %c0_15 = arith.constant 0 : index
    %c0_16 = arith.constant 0 : index
    %24 = vector.load %arg7[%c0_15, %c0_16] : memref<1x2xf32, #tpu.memory_space<vmem>>, vector<1x2xf32>
    %cst_17 = arith.constant dense<0xFF800000> : vector<2xf32>
    %25 = vector.multi_reduction <maximumf>, %22, %cst_17 [0] : vector<8x2xf32> to vector<2xf32>
    %26 = vector.shape_cast %25 : vector<2xf32> to vector<1x2xf32>
    %27 = arith.maximumf %24, %26 : vector<1x2xf32>
    %28 = arith.subf %24, %27 : vector<1x2xf32>
    %29 = math.exp %28 : vector<1x2xf32>
    %30 = vector.broadcast %27 : vector<1x2xf32> to vector<8x2xf32>
    %31 = arith.subf %22, %30 : vector<8x2xf32>
    %32 = math.exp %31 : vector<8x2xf32>
    %c0_18 = arith.constant 0 : index
    %c0_19 = arith.constant 0 : index
    %33 = vector.load %arg8[%c0_18, %c0_19] : memref<1x2xf32, #tpu.memory_space<vmem>>, vector<1x2xf32>
    %34 = arith.mulf %29, %33 : vector<1x2xf32>
    %cst_20 = arith.constant dense<0.000000e+00> : vector<2xf32>
    %35 = vector.multi_reduction <add>, %32, %cst_20 [0] : vector<8x2xf32> to vector<2xf32>
    %36 = vector.shape_cast %35 : vector<2xf32> to vector<1x2xf32>
    %37 = arith.addf %34, %36 : vector<1x2xf32>
    %c0_21 = arith.constant 0 : index
    %c0_22 = arith.constant 0 : index
    %38 = vector.load %arg8[%c0_21, %c0_22] : memref<1x2xf32, #tpu.memory_space<vmem>>, vector<1x2xf32>
    tpu.vector_store %arg8[%c0_21, %c0_22], %37 {strides = array<i32>} : memref<1x2xf32, #tpu.memory_space<vmem>>, vector<1x2xf32>,
    %c0_23 = arith.constant 0 : index
    %c0_24 = arith.constant 0 : index
    %39 = vector.load %arg7[%c0_23, %c0_24] : memref<1x2xf32, #tpu.memory_space<vmem>>, vector<1x2xf32>
    tpu.vector_store %arg7[%c0_23, %c0_24], %27 {strides = array<i32>} : memref<1x2xf32, #tpu.memory_space<vmem>>, vector<1x2xf32>,
    %40 = arith.truncf %32 : vector<8x2xf32> to vector<8x2xbf16>
    %cst_25 = arith.constant dense<0.000000e+00> : vector<32x2xf32>
    %41 = tpu.matmul %3, %40, %cst_25 {dimension_numbers = #tpu.dot_dimension_numbers<[0], [0], [1], [1], [0, 1, 1, 1], [], []>} : vector<8x32xbf16>, vector<8x2xbf16>, vector<32x2xf32> -> vector<32x2xf32>
    %c0_26 = arith.constant 0 : index
    %c0_27 = arith.constant 0 : index
    %42 = vector.load %arg9[%c0_26, %c0_27] : memref<32x2xf32, #tpu.memory_space<vmem>>, vector<32x2xf32>
    %43 = vector.broadcast %29 : vector<1x2xf32> to vector<32x2xf32>
    %44 = arith.mulf %43, %42 : vector<32x2xf32>
    %45 = arith.addf %44, %41 : vector<32x2xf32>
    %c0_28 = arith.constant 0 : index
    %c0_29 = arith.constant 0 : index
    %46 = vector.load %arg9[%c0_28, %c0_29] : memref<32x2xf32, #tpu.memory_space<vmem>>, vector<32x2xf32>
    tpu.vector_store %arg9[%c0_28, %c0_29], %45 {strides = array<i32>} : memref<32x2xf32, #tpu.memory_space<vmem>>, vector<32x2xf32>,
    %c0_i32_30 = arith.constant 0 : i32
    %47 = arith.cmpi eq, %arg0, %c0_i32_30 : i32
    %48 = arith.extui %47 : i1 to i32
    %c0_i32_31 = arith.constant 0 : i32
    %49 = arith.cmpi ne, %48, %c0_i32_31 : i32
    scf.if %49 {
      %c0_32 = arith.constant 0 : index
      %c0_33 = arith.constant 0 : index
      %50 = vector.load %arg9[%c0_32, %c0_33] : memref<32x2xf32, #tpu.memory_space<vmem>>, vector<32x2xf32>
      %c0_34 = arith.constant 0 : index
      %c0_35 = arith.constant 0 : index
      %51 = vector.load %arg8[%c0_34, %c0_35] : memref<1x2xf32, #tpu.memory_space<vmem>>, vector<1x2xf32>
      %52 = tpu.reciprocal %51 {approx = true} : vector<1x2xf32> -> vector<1x2xf32>
      %53 = vector.broadcast %52 : vector<1x2xf32> to vector<32x2xf32>
      %54 = arith.mulf %50, %53 : vector<32x2xf32>
      %c0_36 = arith.constant 0 : index
      %c0_37 = arith.constant 0 : index
      %55 = vector.load %arg9[%c0_36, %c0_37] : memref<32x2xf32, #tpu.memory_space<vmem>>, vector<32x2xf32>
      tpu.vector_store %arg9[%c0_36, %c0_37], %54 {strides = array<i32>} : memref<32x2xf32, #tpu.memory_space<vmem>>, vector<32x2xf32>,
    } else {
    }
    return
  }
  func.func @transform_0(%arg0: i32) -> (i32, i32) {
    %c0_i32 = arith.constant 0 : i32
    %c0_i32_0 = arith.constant 0 : i32
    return %arg0, %c0_i32 : i32, i32
  }
  func.func @transform_1(%arg0: i32) -> (i32, i32) {
    %c0_i32 = arith.constant 0 : i32
    %c0_i32_0 = arith.constant 0 : i32
    %c0_i32_1 = arith.constant 0 : i32
    return %c0_i32, %c0_i32_0 : i32, i32
  }
  func.func @transform_2(%arg0: i32) -> (i32, i32) {
    %c0_i32 = arith.constant 0 : i32
    %c0_i32_0 = arith.constant 0 : i32
    %c0_i32_1 = arith.constant 0 : i32
    return %c0_i32, %c0_i32_0 : i32, i32
  }
  func.func @transform_3(%arg0: i32) -> (i32, i32) {
    %c0_i32 = arith.constant 0 : i32
    %c0_i32_0 = arith.constant 0 : i32
    %c0_i32_1 = arith.constant 0 : i32
    return %c0_i32, %c0_i32_0 : i32, i32
  }
  func.func @transform_4(%arg0: i32) -> (i32, i32) {
    %c0_i32 = arith.constant 0 : i32
    %c0_i32_0 = arith.constant 0 : i32
    %c0_i32_1 = arith.constant 0 : i32
    return %c0_i32, %c0_i32_0 : i32, i32
  }
  func.func @transform_5(%arg0: i32) -> (i32, i32) {
    %c0_i32 = arith.constant 0 : i32
    %c0_i32_0 = arith.constant 0 : i32
    return %arg0, %c0_i32 : i32, i32
  }
  func.func @transform_6(%arg0: i32) -> (i32, i32) {
    %c0_i32 = arith.constant 0 : i32
    %c0_i32_0 = arith.constant 0 : i32
    %c0_i32_1 = arith.constant 0 : i32
    return %c0_i32, %c0_i32_0 : i32, i32
  }
  func.func @transform_7(%arg0: i32) -> (i32, i32) {
    %c0_i32 = arith.constant 0 : i32
    %c0_i32_0 = arith.constant 0 : i32
    %c0_i32_1 = arith.constant 0 : i32
    return %c0_i32, %c0_i32_0 : i32, i32
  }
  func.func @transform_8(%arg0: i32) -> (i32, i32) {
    %c0_i32 = arith.constant 0 : i32
    %c0_i32_0 = arith.constant 0 : i32
    %c0_i32_1 = arith.constant 0 : i32
    return %c0_i32, %c0_i32_0 : i32, i32
  }
}

</mosaic_0001>

<bundles_post_ra>
// kernel: tpu_custom_call.1
= control target key start
LH: loop header
LB: loop body
LE: loop exit
PB: predicated region body
PF: predicated region fallthrough
CT: control target
= control target key end

     0   :  { %14 = vsyncpa [#allocation3], 0  ;;  %v491_v1 = vmov 0.0   ;;  %vm492_vm0 = vmmov 0   ;;  %s657_s0 = inlined_call_operand.vmem [shape: bf16[8,32], index: 0, kind: input, shape index: {}]   ;;  %s658_s1 = inlined_call_operand.vmem [shape: bf16[32,16], index: 1, kind: input, shape index: {}]   ;;  %s659_s2 = inlined_call_operand.vmem [shape: f32[1,16], index: 2, kind: input, shape index: {}]   ;;  %s660_s3 = inlined_call_operand.vmem [shape: f32[16,2], index: 3, kind: input, shape index: {}]   ;;  %s661_s4 = inlined_call_operand.vmem [shape: f32[1,2], index: 4, kind: input, shape index: {}]   ;;  %s662_s5 = inlined_call_operand.vmem [shape: f32[8,2], index: 5, kind: output, shape index: {0}]   ;;  %s663_s6 = inlined_call_operand.hbm [shape: f32[1,2], index: 6, kind: output, shape index: {1}]   ;;  %s664_s7 = inlined_call_operand.hbm [shape: f32[1,2], index: 7, kind: output, shape index: {2}]   ;;  %s665_s8 = inlined_call_operand.vmem [shape: f32[32,2], index: 8, kind: output, shape index: {3}]  }
   0x1   :  { %v437_v0 = vld [vmem:[%s658_s1 + $0x8] sm:$0xff]   ;;  %409 = vmatprep.subr.bf16.mxu0 %v491_v1  ;;  %417 = vmatprep.subr.mxu1 %v491_v1  ;;  %v438_v2 = vld [vmem:[%s658_s1] sm:$0xff]  }
   0x2   :  { %410 = vmatpush3.bf16.msra.mxu0 %v437_v0  ;;  %413 = vmatprep.mubr.msk.bf16.mxu0 %vm492_vm0, %v491_v1  ;;  %v39_v3 = vld [vmem:[%s657_s0] sm:$0xf] }
   0x3   :  { %411 = vmatprep.subr.bf16.mxu0 %v491_v1  ;;  %421 = vmatprep.mubr.msk.f32.mxu1 %vm492_vm0, %v491_v1 }
   0x4   :  { %15 = vsyncpa [#allocation5], 0  ;;  %235 = vxpose.xlu0.c.b16.start.end [1/1] (short) (narrow) %v39_v3, 32  ;;  %vm63_vm1 = vcmask 261120   ;;  %v109_v4 = vld [vmem:[%s660_s3 + $0x8] sm:$0xff]  ;;  %v108_v5 = vld [vmem:[%s660_s3] sm:$0xff]  ;;  %v213_v22 = vlaneseq }
   0x5   :  { %418 = vmatpush3.msra.mxu1 %v109_v4  ;;  %vm31_vm2 = vcmask 8192   ;;  %vm34_vm3 = vcmask 15360   ;;  %v493_v6 = vmov -1e+30   ;;  %v392_v7 = vld [vmem:[%s659_s2] ss:$0 sm:$0xff] }
   0x6   :  { %412 = vmatpush3.bf16.msra.mxu0 %v438_v2  ;;  %419 = vmatprep.subr.mxu1 %v491_v1  ;;  %32 = vst.msk [vmem:[#allocation2] sm:$0x1] %vm31_vm2, %v493_v6  ;;  %33 = vst.msk [vmem:[#allocation4] sm:$0x1] %vm31_vm2, %v491_v1  ;;  %vm117_vm4 = vcmask 130048   ;;  %vm251_vm5 = vcmask 64512  }
   0x7   :  { %420 = vmatpush3.msra.mxu1 %v108_v5  ;;  %35 = vst.msk [vmem:[%s665_s8] sm:$0xff] %vm34_vm3, %v491_v1  ;;  %36 = vst.msk [vmem:[%s665_s8 + $0x8] sm:$0xff] %vm34_vm3, %v491_v1  ;;  %v396_v15 = vld [vmem:[%s661_s4] ss:$0 sm:$0xff]  ;;  %v214_v25 = vshrl.u32 %v213_v22, 7  ;;  %vm258_vm6 = vcmask 1043456  }
   0x8   :  { %37 = vst.msk [vmem:[%s665_s8 + $0x10] sm:$0xff] %vm34_vm3, %v491_v1  ;;  %38 = vst.msk [vmem:[%s665_s8 + $0x18] sm:$0xff] %vm34_vm3, %v491_v1  ;;  %s494_s4 = smov [#allocation2]   ;;  %s495_s25 = smov [#allocation4]  }
   0x9   :  { %414 = vmatmul.mubr.msk.bf16.vlgmr.msra.gmra.mxu0 %vm63_vm1, %v39_v3  ;;  %v586_v29 = vsub.s32 0, %v214_v25  ;;  %s374_s26 = sshll.u32 %s495_s25, 4  ;;  %s375_s26 = int_to_ptr.vmem [resolvable:$true] %s374_s26 }
   0xd   :  { %v200_v27 = vld [vmem:[#allocation2] sm:$0x1]  ;;  %v221_v47 = vld [vmem:[#allocation4] sm:$0x1] }
  0x66   :  { %v243_v14 = vpop.trf.xlu0 }
  0x6a   :  { %v244_v43 = vpop.trf.xlu0 }
  0xc9   :  { %v101_v8 = vpop.f32.mrf.mxu0 }
  0xca   :  { %v102_v9 = vadd.f32 %v392_v7, %v101_v8 }
  0xcb   :  { %v415_v10 = vpop.f32.mrf.mxu0 }
  0xcc   :  { %439 = vtanh.f32 %v102_v9 }
  0xcd   :  { %v104_v11 = vpop.f32.mrf.mxu0 }
  0xcf   :  { %v416_v12 = vpop.f32.mrf.mxu0 }
  0xd9   :  { %v440_v13 = vpop.eup %439 }
  0xda   :  { %422 = vmatmul.mubr.msk.f32.vlgmr.msra.gmra.mxu1 %vm117_vm4, %v440_v13 }
  0xdb   :  { %426 = vmatprep.mubr.msk.bf16.mxu1 %vm251_vm5, %v243_v14 }
 0x19a   :  { %v187_v16 = vpop.f32.mrf.mxu1 }
 0x19b   :  { %v188_v17 = vadd.f32 %v396_v15, %v187_v16 }
 0x19c   :  { %v423_v18 = vpop.f32.mrf.mxu1 }
 0x19d   :  { %199 = vst.msk [vmem:[%s662_s5] sm:$0xff] %vm34_vm3, %v188_v17  ;;  %v201_v19 = vsel %vm34_vm3, %v188_v17, -inf  ;;  %s364_s5 = sshll.u32 %s494_s4, 4  ;;  %s365_s5 = int_to_ptr.vmem [resolvable:$true] %s364_s5 }
 0x19e   :  { %v202_v20 = vrot.slane %v201_v19, 4  ;;  %s447_s27 = scalar_lea.vmem %s365_s5, 16  ;;  %s451_s28 = scalar_lea.vmem %s365_s5, 32 }
 0x19f   :  { %p448_p0 = scmp.ne.s32.totalorder %s365_s5, %s447_s27  ;;  %p452_p1 = scmp.lt.s32.totalorder %s365_s5, %s365_s5 }
 0x1a0   :  { %v203_v21 = vmax.f32 %v201_v19, %v202_v20  ;;  %p453_p2 = scmp.lt.s32.totalorder %s451_s28, %s447_s27 }
 0x1a2   :  { %v204_v23 = vrot.slane %v203_v21, 2  ;;  %p454_p3 = por %p453_p2, %p452_p1 }
 0x1a4   :  { %v205_v24 = vmax.f32 %v203_v21, %v204_v23  ;;  %p455_p4 = pnand %p454_p3, %p448_p0 }
 0x1a6   :  { %v206_v26 = vrot.slane %v205_v24, 1 }
 0x1a8   :  { %v207_v28 = vmax.f32 %v205_v24, %v206_v26 }
 0x1aa   :  { %v208_v30 = vmax.f32 %v200_v27, %v207_v28 }
 0x1ac   :  { %v209_v31 = vsub.f32 %v200_v27, %v208_v30  ;;  %v216_v32 = vrot.slane %v208_v30, %v586_v29  ;;  %233 = vst.msk [vmem:[#allocation2] sm:$0x1] %vm31_vm2, %v208_v30 }
 0x1ae   :  { %v210_v33 = vmul.f32 1.442695, %v209_v31  ;;  %v218_v34 = vsub.f32 %v188_v17, %v216_v32 }
 0x1b0   :  { %441 = vpow2.f32 %v210_v33  ;;  %v219_v35 = vmul.f32 1.442695, %v218_v34 }
 0x1b2   :  { %443 = vpow2.f32 %v219_v35 }
 0x1bd   :  { %v442_v36 = vpop.eup %441 }
 0x1be   :  { %v319_v37 = vrot.slane %v442_v36, %v586_v29  ;;  %v222_v49 = vmul.f32 %v442_v36, %v221_v47 }
 0x1bf   :  { %v444_v38 = vpop.eup %443 }
 0x1c0   :  { %v234_v39 = vpack.c.bf16 %v444_v38, %v444_v38  ;;  %v223_v40 = vsel %vm34_vm3, %v444_v38, 0.0 }
 0x1c1   :  { %v224_v42 = vrot.slane %v223_v40, 4 }
 0x1c2   :  { %430 = vmatprep.subr.msk.bf16.mxu1 %vm258_vm6, %v234_v39  ;;  %v260_v41 = vsel %vm258_vm6, %v234_v39, 0 }
 0x1c3   :  { %425 = vmatpush3.bf16.msra.mxu1 %v260_v41  ;;  %v225_v44 = vadd.f32 %v224_v42, %v223_v40 }
 0x1c5   :  { %v226_v45 = vrot.slane %v225_v44, 2 }
 0x1c6   :  { %427 = vmatmul.mubr.msk.bf16.vlgmr.msra.gmra.mxu1 %vm251_vm5, %v244_v43 }
 0x1c7   :  { %v227_v46 = vadd.f32 %v226_v45, %v225_v44 }
 0x1c9   :  { %v228_v48 = vrot.slane %v227_v46, 1 }
 0x1cb   :  { %v229_v50 = vadd.f32 %v228_v48, %v227_v46 }
 0x1cd   :  { %v230_v51 = vadd.f32 %v229_v50, %v222_v49 }
 0x1cf   :  { %232 = vst.msk [vmem:[#allocation4] sm:$0x1] %vm31_vm2, %v230_v51 }
 0x1d0   :  { %458 = shalt.err (!%p455_p4)
}
 0x1d1   :  { %367 = dma.vmem_to_hbm [thread:$0]  %s365_s5, 16, %s663_s6, [#allocation3]  }
 0x1d2   :  { %s467_s9 = scalar_lea.vmem %s375_s26, 16  ;;  %s471_s10 = scalar_lea.vmem %s375_s26, 32 }
 0x1d3   :  { %p468_p5 = scmp.ne.s32.totalorder %s375_s26, %s467_s9  ;;  %p472_p6 = scmp.lt.s32.totalorder %s375_s26, %s375_s26 }
 0x1d4   :  { %p473_p7 = scmp.lt.s32.totalorder %s471_s10, %s467_s9 }
 0x1d6   :  { %p474_p8 = por %p473_p7, %p472_p6 }
 0x1d8   :  { %p475_p9 = pnand %p474_p8, %p468_p5 }
 0x1da   :  { %478 = shalt.err (!%p475_p9)
}
 0x1db   :  { %377 = dma.vmem_to_hbm [thread:$0]  %s375_s26, 16, %s664_s7, [#allocation5]   ;;  %v340_v52 = vld [vmem:[#allocation4] sm:$0x1]  ;;  %v313_v53 = vld [vmem:[%s665_s8 + $0x10] sm:$0xff]  ;;  %v314_v57 = vld [vmem:[%s665_s8 + $0x18] sm:$0xff] }
 0x1dc   :  { %445 = vrcp.f32 %v340_v52  ;;  %v311_v54 = vld [vmem:[%s665_s8] sm:$0xff]  ;;  %v323_v55 = vmul.f32 %v319_v37, %v313_v53  ;;  %v312_v61 = vld [vmem:[%s665_s8 + $0x8] sm:$0xff]  ;;  %v324_v63 = vmul.f32 %v319_v37, %v314_v57 }
 0x1dd   :  { %v321_v59 = vmul.f32 %v319_v37, %v311_v54  ;;  %v322_v2 = vmul.f32 %v319_v37, %v312_v61 }
 0x1e9   :  { %v446_v3 = vpop.eup %445 }
 0x1ea   :  { %v346_v6 = vrot.slane %v446_v3, %v586_v29 }
 0x286   :  { %v428_v56 = vpop.f32.mrf.mxu1 }
 0x287   :  { %v327_v58 = vadd.f32 %v428_v56, %v323_v55 }
 0x288   :  { %v296_v60 = vpop.f32.mrf.mxu1 }
 0x289   :  { %331 = vst.msk [vmem:[%s665_s8 + $0x10] sm:$0xff] %vm34_vm3, %v327_v58  ;;  %v325_v62 = vadd.f32 %v321_v59, %v296_v60 }
 0x28a   :  { %v429_v0 = vpop.f32.mrf.mxu1 }
 0x28b   :  { %329 = vst.msk [vmem:[%s665_s8] sm:$0xff] %vm34_vm3, %v325_v62  ;;  %v328_v1 = vadd.f32 %v429_v0, %v324_v63 }
 0x28c   :  { %v299_v4 = vpop.f32.mrf.mxu1 }
 0x28d   :  { %332 = vst.msk [vmem:[%s665_s8 + $0x18] sm:$0xff] %vm34_vm3, %v328_v1  ;;  %v326_v5 = vadd.f32 %v322_v2, %v299_v4 }
 0x28f   :  { %330 = vst.msk [vmem:[%s665_s8 + $0x8] sm:$0xff] %vm34_vm3, %v326_v5 }
 0x290   :  { %v338_v7 = vld [vmem:[%s665_s8 + $0x10] sm:$0xff] }
 0x291   :  { %v350_v8 = vmul.f32 %v346_v6, %v338_v7 }
 0x292   :  { %v336_v9 = vld [vmem:[%s665_s8] sm:$0xff] }
 0x293   :  { %v348_v10 = vmul.f32 %v346_v6, %v336_v9  ;;  %354 = vst.msk [vmem:[%s665_s8 + $0x10] sm:$0xff] %vm34_vm3, %v350_v8 }
 0x294   :  { %v339_v11 = vld [vmem:[%s665_s8 + $0x18] sm:$0xff] }
 0x295   :  { %v351_v12 = vmul.f32 %v346_v6, %v339_v11  ;;  %352 = vst.msk [vmem:[%s665_s8] sm:$0xff] %vm34_vm3, %v348_v10 }
 0x296   :  { %v337_v13 = vld [vmem:[%s665_s8 + $0x8] sm:$0xff] }
 0x297   :  { %v349_v14 = vmul.f32 %v346_v6, %v337_v13  ;;  %355 = vst.msk [vmem:[%s665_s8 + $0x18] sm:$0xff] %vm34_vm3, %v351_v12 }
 0x299   :  { %353 = vst.msk [vmem:[%s665_s8 + $0x8] sm:$0xff] %vm34_vm3, %v349_v14 }
 0x29a   :  { %487 = dma.done.wait [#allocation3], 16  }
 0x29b   :  { %488 = vsyncadd [#allocation3], 4294967280 }
 0x29c   :  { %489 = dma.done.wait [#allocation5], 16  }
 0x29d   :  { %490 = vsyncadd [#allocation5], 4294967280 }
 0x29e   :  { %390 = vsyncpa [#allocation3], 1 }
 0x29f   :  { %391 = vsyncpa [#allocation5], 1 }

</bundles_post_ra>
